<compile_context>
chip_gen: v6e
topology: v6e:2x2x1
jax: 0.10.0
libtpu: 0.0.40
codegen_flags: <defaults>
</compile_context>

<pallas_src>
import functools

import jax
import jax.numpy as jnp
from jax.experimental import pallas as pl
from jax.experimental.pallas import tpu as pltpu

IN_PAD = 128    # padded input-feature lanes (last lane carries the constant 1 for the fc1 bias)
HID_PAD = 128   # padded hidden lanes (last lane carries the constant 1 for the fc2 bias)
OUT_PAD = 128   # lane-dense padded Q-value lanes (sliced back to nb_action in the wrapper)
MAX_TILE_B = 512  # max batch rows per grid step


def _network_kernel(x_ref, w1_ref, w2_ref, o_ref):
    # fc1 (bias folded into W1 via the constant-1 input lane) — bf16 MXU feed, f32 accumulate.
    h = jnp.dot(x_ref[...], w1_ref[...], preferred_element_type=jnp.float32)
    # ReLU in f32 on the VPU, then narrow for the second MXU pass.
    h = jnp.maximum(h, 0.0).astype(w2_ref.dtype)
    # fc2 (bias folded into W2; hidden lane HID_PAD-1 is relu(1) == 1 so the bias row applies).
    q = jnp.dot(h, w2_ref[...], preferred_element_type=jnp.float32)
    o_ref[...] = q.astype(o_ref.dtype)   # lane-dense [tile_b, 128] store


def _round_up(x, m):
    return -(-x // m) * m


@functools.partial(jax.jit, static_argnames=("nb_action",))
def network_forward(state, w1_packed, w2_packed, nb_action):
    """state: [B, input_size] f32; w1_packed: [IN_PAD, HID_PAD]; w2_packed: [HID_PAD, OUT_PAD]
    (biases folded in, see pack_params) -> Q-values [B, nb_action] f32."""
    B, in_size = state.shape
    compute_dtype = w1_packed.dtype

    # Pad features to a full 128-lane slab and plant the constant-1 bias lane.
    x = jnp.zeros((B, IN_PAD), jnp.float32)
    x = x.at[:, :in_size].set(state)
    x = x.at[:, IN_PAD - 1].set(1.0)
    x = x.astype(compute_dtype)

    # Batch tiling: one grid step per tile_b rows; weight blocks stay VMEM-resident.
    tile_b = min(MAX_TILE_B, _round_up(max(B, 1), 8))
    B_pad = _round_up(B, tile_b)
    if B_pad != B:
        x = jnp.pad(x, ((0, B_pad - B), (0, 0)))

    flops = 2 * B_pad * (IN_PAD * HID_PAD + HID_PAD * OUT_PAD)
    bytes_accessed = (x.size * x.dtype.itemsize
                      + w1_packed.size * w1_packed.dtype.itemsize
                      + w2_packed.size * w2_packed.dtype.itemsize
                      + B_pad * OUT_PAD * 4)

    q_pad = pl.pallas_call(
        _network_kernel,
        out_shape=jax.ShapeDtypeStruct((B_pad, OUT_PAD), jnp.float32),
        grid=(B_pad // tile_b,),
        in_specs=[
            pl.BlockSpec((tile_b, IN_PAD), lambda i: (i, 0)),
            pl.BlockSpec((IN_PAD, HID_PAD), lambda i: (0, 0)),
            pl.BlockSpec((HID_PAD, OUT_PAD), lambda i: (0, 0)),
        ],
        out_specs=pl.BlockSpec((tile_b, OUT_PAD), lambda i: (i, 0)),
        compiler_params=pltpu.CompilerParams(
            dimension_semantics=("parallel",)),   # shards the batch axis across v7x's 2 TCs
        cost_estimate=pl.CostEstimate(
            flops=flops, transcendentals=0, bytes_accessed=bytes_accessed),
    )(x, w1_packed, w2_packed)

    # Lane-dense slab -> the nb_action Q-values the module actually returns.
    return q_pad[:B, :nb_action]


def init_params(key, input_size, nb_action, hidden_layers):
    """torch nn.Linear-style init: U(+-1/sqrt(fan_in)); returns f32 reference params."""
    k1, k2, k3, k4 = jax.random.split(key, 4)
    lim1 = 1.0 / jnp.sqrt(jnp.float32(input_size))
    lim2 = 1.0 / jnp.sqrt(jnp.float32(hidden_layers))
    w1 = jax.random.uniform(k1, (input_size, hidden_layers), jnp.float32, -lim1, lim1)
    b1 = jax.random.uniform(k2, (hidden_layers,), jnp.float32, -lim1, lim1)
    w2 = jax.random.uniform(k3, (hidden_layers, nb_action), jnp.float32, -lim2, lim2)
    b2 = jax.random.uniform(k4, (nb_action,), jnp.float32, -lim2, lim2)
    return w1, b1, w2, b2


def pack_params(w1, b1, w2, b2, dtype=jnp.bfloat16):
    """Zero-pad to 128x128 slabs and fold the biases in.
    Row IN_PAD-1 of W1 holds b1 (driven by the constant-1 input lane) and routes the
    constant 1 to hidden lane HID_PAD-1 so row HID_PAD-1 of W2 can hold b2."""
    in_size, hidden = w1.shape
    nb_action = w2.shape[1]
    assert in_size < IN_PAD and hidden < HID_PAD and nb_action <= OUT_PAD, \
        "bias-folding needs one free lane in the input and hidden slabs"
    W1 = jnp.zeros((IN_PAD, HID_PAD), jnp.float32)
    W1 = W1.at[:in_size, :hidden].set(w1)
    W1 = W1.at[IN_PAD - 1, :hidden].set(b1)
    W1 = W1.at[IN_PAD - 1, HID_PAD - 1].set(1.0)
    W2 = jnp.zeros((HID_PAD, OUT_PAD), jnp.float32)
    W2 = W2.at[:hidden, :nb_action].set(w2)
    W2 = W2.at[HID_PAD - 1, :nb_action].set(b2)
    return W1.astype(dtype), W2.astype(dtype)


def _reference(state, w1, b1, w2, b2):
    return jnp.maximum(state @ w1 + b1[None, :], 0.0) @ w2 + b2[None, :]


if __name__ == "__main__":
    # Shapes implied by the self-driving-car DQN: 5 sensor/orientation inputs, 3 actions.
    batch, input_size, nb_action, hidden_layers = 2, 5, 3, 32

    key = jax.random.PRNGKey(0)
    k_params, k_state, k_state2 = jax.random.split(key, 3)
    w1, b1, w2, b2 = init_params(k_params, input_size, nb_action, hidden_layers)
    W1, W2 = pack_params(w1, b1, w2, b2, dtype=jnp.bfloat16)
    state = jax.random.normal(k_state, (batch, input_size), jnp.float32)

    q_values = network_forward(state, W1, W2, nb_action)
    q_values = jax.block_until_ready(q_values)
    assert q_values.shape == (batch, nb_action)

    # Tight check against a reference with the same bf16-quantized, bias-folded weights.
    w1f, w2f = W1.astype(jnp.float32), W2.astype(jnp.float32)
    xf = (jnp.zeros((batch, IN_PAD), jnp.float32)
          .at[:, :input_size].set(state)
          .at[:, IN_PAD - 1].set(1.0))
    ref_packed = (jnp.maximum(xf @ w1f, 0.0) @ w2f)[:, :nb_action]
    assert jnp.allclose(q_values, ref_packed, atol=2e-3, rtol=2e-3)

    # Loose check against the original f32 nn.Module semantics (difference = bf16 quantization).
    ref_f32 = _reference(state, w1, b1, w2, b2)
    assert jnp.allclose(q_values, ref_f32, atol=5e-2, rtol=5e-2)

    # Exercise a ragged replay-buffer-sized batch (pads rows, multiple grid steps).
    big_batch = 300
    state_big = jax.random.normal(k_state2, (big_batch, input_size), jnp.float32)
    q_big = jax.block_until_ready(network_forward(state_big, W1, W2, nb_action))
    assert q_big.shape == (big_batch, nb_action)
    ref_big = _reference(state_big, w1, b1, w2, b2)
    assert jnp.allclose(q_big, ref_big, atol=5e-2, rtol=5e-2)

    print("KERNEL_OK")
</pallas_src>

<mosaic_0001>
module attributes {stable_mosaic.version = 11 : i64} {
  func.func @_network_kernel(%arg0: i32, %arg1: memref<8x128xbf16, #tpu.memory_space<vmem>>, %arg2: memref<128x128xbf16, #tpu.memory_space<vmem>>, %arg3: memref<128x128xbf16, #tpu.memory_space<vmem>>, %arg4: memref<8x128xf32, #tpu.memory_space<vmem>>) attributes {dimension_semantics = [#tpu.dimension_semantics<parallel>], iteration_bounds = array<i64: 1>, scalar_prefetch = 0 : i64, scratch_operands = 0 : i64, tpu.core_type = #tpu.core_type<tc>, window_params = [{transform_indices = @transform_0, window_bounds = array<i64: 8, 128>}, {pipeline_mode = #tpu.pipeline_mode<synchronous>, transform_indices = @transform_1, window_bounds = array<i64: 128, 128>}, {pipeline_mode = #tpu.pipeline_mode<synchronous>, transform_indices = @transform_2, window_bounds = array<i64: 128, 128>}, {transform_indices = @transform_3, window_bounds = array<i64: 8, 128>}]} {
    %c0 = arith.constant 0 : index
    %c0_0 = arith.constant 0 : index
    %0 = vector.load %arg1[%c0, %c0_0] : memref<8x128xbf16, #tpu.memory_space<vmem>>, vector<8x128xbf16>
    %c0_1 = arith.constant 0 : index
    %c0_2 = arith.constant 0 : index
    %1 = vector.load %arg2[%c0_1, %c0_2] : memref<128x128xbf16, #tpu.memory_space<vmem>>, vector<128x128xbf16>
    %cst = arith.constant dense<0.000000e+00> : vector<8x128xf32>
    %2 = tpu.matmul %0, %1, %cst {dimension_numbers = #tpu.dot_dimension_numbers<[1], [0], [0], [1], [0, 0, 1, 1], [], []>} : vector<8x128xbf16>, vector<128x128xbf16>, vector<8x128xf32> -> vector<8x128xf32>
    %cst_3 = arith.constant 0.000000e+00 : f32
    %3 = vector.broadcast %cst_3 : f32 to vector<8x128xf32>
    %4 = arith.maximumf %2, %3 : vector<8x128xf32>
    %5 = arith.truncf %4 : vector<8x128xf32> to vector<8x128xbf16>
    %c0_4 = arith.constant 0 : index
    %c0_5 = arith.constant 0 : index
    %6 = vector.load %arg3[%c0_4, %c0_5] : memref<128x128xbf16, #tpu.memory_space<vmem>>, vector<128x128xbf16>
    %cst_6 = arith.constant dense<0.000000e+00> : vector<8x128xf32>
    %7 = tpu.matmul %5, %6, %cst_6 {dimension_numbers = #tpu.dot_dimension_numbers<[1], [0], [0], [1], [0, 0, 1, 1], [], []>} : vector<8x128xbf16>, vector<128x128xbf16>, vector<8x128xf32> -> vector<8x128xf32>
    %c0_7 = arith.constant 0 : index
    %c0_8 = arith.constant 0 : index
    %8 = vector.load %arg4[%c0_7, %c0_8] : memref<8x128xf32, #tpu.memory_space<vmem>>, vector<8x128xf32>
    tpu.vector_store %arg4[%c0_7, %c0_8], %7 {strides = array<i32>} : memref<8x128xf32, #tpu.memory_space<vmem>>, vector<8x128xf32>,
    return
  }
  func.func @transform_0(%arg0: i32) -> (i32, i32) {
    %c0_i32 = arith.constant 0 : i32
    %c0_i32_0 = arith.constant 0 : i32
    return %arg0, %c0_i32 : i32, i32
  }
  func.func @transform_1(%arg0: i32) -> (i32, i32) {
    %c0_i32 = arith.constant 0 : i32
    %c0_i32_0 = arith.constant 0 : i32
    %c0_i32_1 = arith.constant 0 : i32
    return %c0_i32, %c0_i32_0 : i32, i32
  }
  func.func @transform_2(%arg0: i32) -> (i32, i32) {
    %c0_i32 = arith.constant 0 : i32
    %c0_i32_0 = arith.constant 0 : i32
    %c0_i32_1 = arith.constant 0 : i32
    return %c0_i32, %c0_i32_0 : i32, i32
  }
  func.func @transform_3(%arg0: i32) -> (i32, i32) {
    %c0_i32 = arith.constant 0 : i32
    %c0_i32_0 = arith.constant 0 : i32
    return %arg0, %c0_i32 : i32, i32
  }
}

</mosaic_0001>

<bundles_post_ra>
// kernel: network_forward.1
= control target key start
LH: loop header
LB: loop body
LE: loop exit
PB: predicated region body
PF: predicated region fallthrough
CT: control target
= control target key end

     0   :  { %8 = vsyncpa [#allocation3], 0  ;;  %s439_s0 = inlined_call_operand.vmem [shape: bf16[8,128], index: 0, kind: input, shape index: {}]   ;;  %s440_s1 = inlined_call_operand.hbm [shape: bf16[128,128], index: 1, kind: input, shape index: {}]   ;;  %s441_s2 = inlined_call_operand.hbm [shape: bf16[128,128], index: 2, kind: input, shape index: {}]   ;;  %s442_s3 = inlined_call_operand.vmem [shape: f32[8,128], index: 3, kind: output, shape index: {}]  }
   0x1   :  { %9 = vsyncpa [#allocation5], 0  ;;  %s401_s12 = smov [#allocation2]  }
   0x2   :  { %s17_s13 = sshll.u32 %s401_s12, 4  ;;  %s18_s13 = int_to_ptr.vmem [resolvable:$true] %s17_s13 }
   0x3   :  { %s365_s14 = scalar_lea.vmem %s18_s13, 1024  ;;  %p370_p1 = scmp.lt.s32.totalorder %s18_s13, %s18_s13 }
   0x4   :  { %p366_p0 = scmp.ne.s32.totalorder %s18_s13, %s365_s14  ;;  %p371_p2 = scmp.lt.s32.totalorder %s365_s14, %s365_s14 }
   0x6   :  { %p372_p3 = por %p371_p2, %p370_p1 }
   0x8   :  { %p373_p4 = pnand %p372_p3, %p366_p0 }
   0xa   :  { %376 = shalt.err (!%p373_p4)
}
   0xb   :  { %s402_s15 = smov 64   ;;  %s403_s16 = smov 4  }
   0xc   :  { %23 = dma.hbm_to_vmem [thread:$0]  %s440_s1, 1024, %s18_s13, [#allocation3], %s402_s15, %s402_s15, %s403_s16  }
   0xd   :  { %s404_s19 = smov [#allocation4]  }
   0xe   :  { %s29_s20 = sshll.u32 %s404_s19, 4  ;;  %s30_s20 = int_to_ptr.vmem [resolvable:$true] %s29_s20 }
   0xf   :  { %s385_s21 = scalar_lea.vmem %s30_s20, 1024  ;;  %p390_p6 = scmp.lt.s32.totalorder %s30_s20, %s30_s20 }
  0x10   :  { %p386_p5 = scmp.ne.s32.totalorder %s30_s20, %s385_s21  ;;  %p391_p7 = scmp.lt.s32.totalorder %s385_s21, %s385_s21 }
  0x12   :  { %p392_p8 = por %p391_p7, %p390_p6 }
  0x14   :  { %p393_p9 = pnand %p392_p8, %p386_p5 }
  0x16   :  { %396 = shalt.err (!%p393_p9)
}
  0x17   :  { %35 = dma.hbm_to_vmem [thread:$0]  %s441_s2, 1024, %s30_s20, [#allocation5], %s402_s15, %s402_s15, %s403_s16  }
  0x18   :  { %397 = dma.done.wait [#allocation3], 1024  }
  0x19   :  { %398 = vsyncadd [#allocation3], 4294966272 }
  0x1a   :  { %399 = dma.done.wait [#allocation5], 1024  }
  0x1b   :  { %400 = vsyncadd [#allocation5], 4294966272  ;;  %v405_v0 = vmov 0.0   ;;  %vm406_vm0 = vmmov 0   ;;  %v341_v1 = vld [vmem:[#allocation2 + $0x38] sm:$0xff]   ;;  %v342_v2 = vld [vmem:[#allocation2 + $0x30] sm:$0xff]  }
  0x1c   :  { %295 = vmatprep.subr.bf16.mxu0 %v405_v0  ;;  %311 = vmatprep.mubr.msk.bf16.mxu0 %vm406_vm0, %v405_v0  ;;  %v343_v3 = vld [vmem:[#allocation2 + $0x28] sm:$0xff]   ;;  %v349_v4 = vld [vmem:[#allocation4 + $0x38] sm:$0xff]   ;;  %v344_v5 = vld [vmem:[#allocation2 + $0x20] sm:$0xff]  }
  0x1d   :  { %315 = vmatprep.subr.bf16.mxu1 %v405_v0  ;;  %331 = vmatprep.mubr.msk.bf16.mxu1 %vm406_vm0, %v405_v0  ;;  %v350_v6 = vld [vmem:[#allocation4 + $0x30] sm:$0xff]   ;;  %v345_v7 = vld [vmem:[#allocation2 + $0x18] sm:$0xff]   ;;  %v351_v8 = vld [vmem:[#allocation4 + $0x28] sm:$0xff]  }
  0x1e   :  { %296 = vmatpush3.bf16.msra.mxu0 %v341_v1  ;;  %316 = vmatpush3.bf16.msra.mxu1 %v349_v4  ;;  %v346_v9 = vld [vmem:[#allocation2 + $0x10] sm:$0xff]   ;;  %v352_v10 = vld [vmem:[#allocation4 + $0x20] sm:$0xff]   ;;  %v347_v11 = vld [vmem:[#allocation2 + $0x8] sm:$0xff]  }
  0x1f   :  { %297 = vmatprep.subr.bf16.mxu0 %v405_v0  ;;  %317 = vmatprep.subr.bf16.mxu1 %v405_v0  ;;  %v353_v12 = vld [vmem:[#allocation4 + $0x18] sm:$0xff]   ;;  %v348_v13 = vld [vmem:[#allocation2] sm:$0xff]   ;;  %v354_v14 = vld [vmem:[#allocation4 + $0x10] sm:$0xff]  }
  0x20   :  { %v43_v15 = vld [vmem:[%s439_s0] sm:$0xf]  ;;  %v355_v16 = vld [vmem:[#allocation4 + $0x8] sm:$0xff]  }
  0x21   :  { %v356_v17 = vld [vmem:[#allocation4] sm:$0xff]  }
  0x22   :  { %298 = vmatpush3.bf16.msra.mxu0 %v342_v2  ;;  %318 = vmatpush3.bf16.msra.mxu1 %v350_v6 }
  0x23   :  { %299 = vmatprep.subr.bf16.mxu0 %v405_v0  ;;  %319 = vmatprep.subr.bf16.mxu1 %v405_v0 }
  0x26   :  { %300 = vmatpush3.bf16.msra.mxu0 %v343_v3  ;;  %320 = vmatpush3.bf16.msra.mxu1 %v351_v8 }
  0x27   :  { %301 = vmatprep.subr.bf16.mxu0 %v405_v0  ;;  %321 = vmatprep.subr.bf16.mxu1 %v405_v0 }
  0x2a   :  { %302 = vmatpush3.bf16.msra.mxu0 %v344_v5  ;;  %322 = vmatpush3.bf16.msra.mxu1 %v352_v10 }
  0x2b   :  { %303 = vmatprep.subr.bf16.mxu0 %v405_v0  ;;  %323 = vmatprep.subr.bf16.mxu1 %v405_v0 }
  0x2e   :  { %304 = vmatpush3.bf16.msra.mxu0 %v345_v7  ;;  %324 = vmatpush3.bf16.msra.mxu1 %v353_v12 }
  0x2f   :  { %305 = vmatprep.subr.bf16.mxu0 %v405_v0  ;;  %325 = vmatprep.subr.bf16.mxu1 %v405_v0 }
  0x32   :  { %306 = vmatpush3.bf16.msra.mxu0 %v346_v9  ;;  %326 = vmatpush3.bf16.msra.mxu1 %v354_v14 }
  0x33   :  { %307 = vmatprep.subr.bf16.mxu0 %v405_v0  ;;  %327 = vmatprep.subr.bf16.mxu1 %v405_v0 }
  0x36   :  { %308 = vmatpush3.bf16.msra.mxu0 %v347_v11  ;;  %328 = vmatpush3.bf16.msra.mxu1 %v355_v16 }
  0x37   :  { %309 = vmatprep.subr.bf16.mxu0 %v405_v0  ;;  %329 = vmatprep.subr.bf16.mxu1 %v405_v0 }
  0x3a   :  { %310 = vmatpush3.bf16.msra.mxu0 %v348_v13  ;;  %330 = vmatpush3.bf16.msra.mxu1 %v356_v17 }
  0x3d   :  { %312 = vmatmul.mubr.bf16.vlgmr.msra.gmra.mxu0 %v43_v15 }
  0xfd   :  { %v142_v18 = vpop.f32.mrf.mxu0 }
  0xfe   :  { %v148_v19 = vmax.f32 %v142_v18, 0.0 }
  0xff   :  { %v313_v20 = vpop.f32.mrf.mxu0 }
 0x100   :  { %v149_v21 = vpack.c.bf16 %v148_v19, %v148_v19 }
 0x101   :  { %v145_v22 = vpop.f32.mrf.mxu0 }
 0x102   :  { %332 = vmatmul.mubr.bf16.vlgmr.msra.gmra.mxu1 %v149_v21 }
 0x103   :  { %v314_v23 = vpop.f32.mrf.mxu0 }
 0x1c2   :  { %v248_v24 = vpop.f32.mrf.mxu1 }
 0x1c3   :  { %254 = vst [vmem:[%s442_s3] sm:$0xff] %v248_v24 }
 0x1c4   :  { %v333_v25 = vpop.f32.mrf.mxu1 }
 0x1c6   :  { %v251_v26 = vpop.f32.mrf.mxu1 }
 0x1c8   :  { %v334_v27 = vpop.f32.mrf.mxu1 }
 0x1c9   :  { %259 = vsyncpa [#allocation3], 1 }
 0x1ca   :  { %260 = vsyncpa [#allocation5], 1 }

</bundles_post_ra>
